<compile_context>
chip_gen: v7x
topology: tpu7x:2x2x1
jax: 0.10.0
libtpu: 0.0.40
codegen_flags: <defaults>
</compile_context>

<pallas_src>
import jax
import jax.numpy as jnp
from jax.experimental import pallas as pl
from jax.experimental.pallas import tpu as pltpu


def _round_up(n, m):
    return ((n + m - 1) // m) * m


def lstm_cell_kernel(h_ref, x_ref, c_ref, wh_ref, wx_ref, b_ref,
                     h_out_ref, c_out_ref):
    wdt = wh_ref.dtype
    # Two MXU pushes (h @ Wh^T, x @ Wx^T), f32 accumulation, fused f32 bias.
    z = jnp.dot(h_ref[...].astype(wdt), wh_ref[...],
                preferred_element_type=jnp.float32)
    z = z + jnp.dot(x_ref[...].astype(wdt), wx_ref[...],
                    preferred_element_type=jnp.float32)
    z = z + b_ref[...]

    s = jax.nn.sigmoid(z)              # i = f = o (shared weights in module)
    g = jnp.tanh(z)
    c_new = s * (c_ref[...].astype(jnp.float32) + g)   # f*c + i*g, i == f == s
    h_new = s * jnp.tanh(c_new)                        # o * tanh(c')

    h_out_ref[...] = h_new.astype(h_out_ref.dtype)
    c_out_ref[...] = c_new.astype(c_out_ref.dtype)


def prepare_lstm_params(wx, wh, bx, bh, *, param_dtype=jnp.bfloat16):
    """One-time parameter prep (hoisted out of the per-step path).

    wx: [H, D_in], wh: [H, H], bx/bh: [H]  (PyTorch nn.Linear layout).
    Returns (wh_slab [H_pad, H_pad], wx_slab [D_pad, H_pad], b [1, H_pad] f32),
    lane/sublane padded; zero padding is exact for the valid outputs.
    """
    H, D_in = wx.shape
    H_pad = _round_up(H, 128)
    D_pad = _round_up(D_in, 128)
    wh_slab = jnp.pad(wh.T, ((0, H_pad - H), (0, H_pad - H))).astype(param_dtype)
    wx_slab = jnp.pad(wx.T, ((0, D_pad - D_in), (0, H_pad - H))).astype(param_dtype)
    b = jnp.pad((bx + bh).astype(jnp.float32).reshape(1, H),
                ((0, 0), (0, H_pad - H)))
    return wh_slab, wx_slab, b


def _resident_spec(block_shape):
    """Constant-index resident operand; single-buffered to save VMEM."""
    if hasattr(pl, "Buffered"):
        try:
            return pl.BlockSpec(block_shape, lambda i: (0, 0),
                                pipeline_mode=pl.Buffered(1))
        except TypeError:  # older BlockSpec without pipeline_mode
            pass
    return pl.BlockSpec(block_shape, lambda i: (0, 0))


def lstm_cell(x, h, c, wh_slab, wx_slab, b, *, block_b=256):
    """One LSTMCell step. x: [B, D_in], h/c: [B, H]; params from
    prepare_lstm_params. Returns (h_new, c_new), each [B, H]."""
    B, D_in = x.shape
    H = h.shape[1]
    H_pad = wh_slab.shape[1]
    D_pad = wx_slab.shape[0]

    # Largest batch tile that makes sense: fills MXU rows and amortizes
    # per-grid-step overhead, but never exceeds the padded batch.
    block_b = max(8, min(_round_up(block_b, 8), _round_up(B, 8)))
    B_pad = _round_up(B, block_b)
    n_b = B_pad // block_b

    h_p = jnp.pad(h, ((0, B_pad - B), (0, H_pad - H)))
    x_p = jnp.pad(x, ((0, B_pad - B), (0, D_pad - D_in)))
    c_p = jnp.pad(c, ((0, B_pad - B), (0, H_pad - H)))

    w_bytes = (wh_slab.size * wh_slab.dtype.itemsize
               + wx_slab.size * wx_slab.dtype.itemsize
               + b.size * b.dtype.itemsize)
    tile_bytes = block_b * (H_pad * h.dtype.itemsize      # h tile
                            + D_pad * x.dtype.itemsize    # x tile
                            + H_pad * c.dtype.itemsize    # c tile
                            + H_pad * h.dtype.itemsize    # h_out tile
                            + H_pad * c.dtype.itemsize)   # c_out tile
    # Single-buffered resident weights + double-buffered activation tiles
    # + f32 elementwise intermediates headroom.
    vmem_needed = w_bytes + 2 * tile_bytes + 8 * block_b * H_pad * 4 + (2 << 20)
    vmem_limit = int(min(max(vmem_needed, 16 << 20), 64 << 20))

    cost = pl.CostEstimate(
        flops=2 * B_pad * (H_pad + D_pad) * H_pad + 6 * B_pad * H_pad,
        transcendentals=3 * B_pad * H_pad,
        bytes_accessed=int(w_bytes + n_b * tile_bytes),
    )

    h_out, c_out = pl.pallas_call(
        lstm_cell_kernel,
        out_shape=(jax.ShapeDtypeStruct((B_pad, H_pad), h.dtype),
                   jax.ShapeDtypeStruct((B_pad, H_pad), c.dtype)),
        grid=(n_b,),
        in_specs=[
            pl.BlockSpec((block_b, H_pad), lambda i: (i, 0)),   # h tile
            pl.BlockSpec((block_b, D_pad), lambda i: (i, 0)),   # x tile
            pl.BlockSpec((block_b, H_pad), lambda i: (i, 0)),   # c tile
            _resident_spec((H_pad, H_pad)),                     # Wh^T (resident)
            _resident_spec((D_pad, H_pad)),                     # Wx^T (resident)
            _resident_spec((1, H_pad)),                         # fused bias
        ],
        out_specs=(pl.BlockSpec((block_b, H_pad), lambda i: (i, 0)),
                   pl.BlockSpec((block_b, H_pad), lambda i: (i, 0))),
        input_output_aliases={2: 1},                  # padded c buffer -> c_out
        cost_estimate=cost,
        compiler_params=pltpu.CompilerParams(
            dimension_semantics=("parallel",),
            vmem_limit_bytes=vmem_limit),
    )(h_p, x_p, c_p, wh_slab, wx_slab, b)

    return h_out[:B, :H], c_out[:B, :H]


def lstm_cell_ref(x, h, c, wx, wh, bx, bh):
    z = h @ wh.T + bh + x @ wx.T + bx
    s = jax.nn.sigmoid(z)
    g = jnp.tanh(z)
    c_new = s * c + s * g
    h_new = s * jnp.tanh(c_new)
    return h_new, c_new


if __name__ == "__main__":
    key = jax.random.PRNGKey(0)
    B, D_in, H = 2, 16, 32

    k = jax.random.split(key, 7)
    x = jax.random.normal(k[0], (B, D_in), jnp.float32)
    h = jax.random.normal(k[1], (B, H), jnp.float32)
    c = jax.random.normal(k[2], (B, H), jnp.float32)
    # PyTorch nn.Linear shapes: weight [out, in], bias [out].
    wx = jax.random.normal(k[3], (H, D_in), jnp.float32) * 0.1
    wh = jax.random.normal(k[4], (H, H), jnp.float32) * 0.1
    bx = jax.random.normal(k[5], (H,), jnp.float32) * 0.1
    bh = jax.random.normal(k[6], (H,), jnp.float32) * 0.1

    h_ref, c_ref = lstm_cell_ref(x, h, c, wx, wh, bx, bh)
    step = jax.jit(lstm_cell)

    # f32 weights: bit-faithful to the PyTorch module.
    params_f32 = prepare_lstm_params(wx, wh, bx, bh, param_dtype=jnp.float32)
    h32, c32 = step(x, h, c, *params_f32)
    jax.block_until_ready((h32, c32))
    assert h32.shape == (B, H) and c32.shape == (B, H)
    assert jnp.allclose(h32, h_ref, atol=1e-5, rtol=1e-5)
    assert jnp.allclose(c32, c_ref, atol=1e-5, rtol=1e-5)

    # bf16 weights (default): halves weight HBM/VMEM traffic; gate math is f32.
    params_bf16 = prepare_lstm_params(wx, wh, bx, bh)
    h16, c16 = step(x, h, c, *params_bf16)
    jax.block_until_ready((h16, c16))
    assert jnp.allclose(h16, h_ref, atol=2e-2, rtol=2e-2)
    assert jnp.allclose(c16, c_ref, atol=2e-2, rtol=2e-2)

    print("KERNEL_OK")
</pallas_src>

<mosaic_0001>
module attributes {stable_mosaic.version = 11 : i64} {
  func.func @lstm_cell_kernel(%arg0: i32, %arg1: memref<8x128xf32, #tpu.memory_space<vmem>>, %arg2: memref<8x128xf32, #tpu.memory_space<vmem>>, %arg3: memref<8x128xf32, #tpu.memory_space<vmem>>, %arg4: memref<128x128xf32, #tpu.memory_space<vmem>>, %arg5: memref<128x128xf32, #tpu.memory_space<vmem>>, %arg6: memref<1x128xf32, #tpu.memory_space<vmem>>, %arg7: memref<8x128xf32, #tpu.memory_space<vmem>>, %arg8: memref<8x128xf32, #tpu.memory_space<vmem>>) attributes {dimension_semantics = [#tpu.dimension_semantics<parallel>], iteration_bounds = array<i64: 1>, scalar_prefetch = 0 : i64, scratch_operands = 0 : i64, tpu.core_type = #tpu.core_type<tc>, window_params = [{transform_indices = @transform_0, window_bounds = array<i64: 8, 128>}, {transform_indices = @transform_1, window_bounds = array<i64: 8, 128>}, {transform_indices = @transform_2, window_bounds = array<i64: 8, 128>}, {pipeline_mode = #tpu.pipeline_mode<synchronous>, transform_indices = @transform_3, window_bounds = array<i64: 128, 128>}, {pipeline_mode = #tpu.pipeline_mode<synchronous>, transform_indices = @transform_4, window_bounds = array<i64: 128, 128>}, {pipeline_mode = #tpu.pipeline_mode<synchronous>, transform_indices = @transform_5, window_bounds = array<i64: 1, 128>}, {transform_indices = @transform_6, window_bounds = array<i64: 8, 128>}, {transform_indices = @transform_7, window_bounds = array<i64: 8, 128>}]} {
    %c0 = arith.constant 0 : index
    %c0_0 = arith.constant 0 : index
    %0 = vector.load %arg1[%c0, %c0_0] : memref<8x128xf32, #tpu.memory_space<vmem>>, vector<8x128xf32>
    %c0_1 = arith.constant 0 : index
    %c0_2 = arith.constant 0 : index
    %1 = vector.load %arg4[%c0_1, %c0_2] : memref<128x128xf32, #tpu.memory_space<vmem>>, vector<128x128xf32>
    %cst = arith.constant dense<0.000000e+00> : vector<8x128xf32>
    %2 = tpu.matmul %0, %1, %cst {dimension_numbers = #tpu.dot_dimension_numbers<[1], [0], [0], [1], [0, 0, 1, 1], [], []>} : vector<8x128xf32>, vector<128x128xf32>, vector<8x128xf32> -> vector<8x128xf32>
    %c0_3 = arith.constant 0 : index
    %c0_4 = arith.constant 0 : index
    %3 = vector.load %arg2[%c0_3, %c0_4] : memref<8x128xf32, #tpu.memory_space<vmem>>, vector<8x128xf32>
    %c0_5 = arith.constant 0 : index
    %c0_6 = arith.constant 0 : index
    %4 = vector.load %arg5[%c0_5, %c0_6] : memref<128x128xf32, #tpu.memory_space<vmem>>, vector<128x128xf32>
    %cst_7 = arith.constant dense<0.000000e+00> : vector<8x128xf32>
    %5 = tpu.matmul %3, %4, %cst_7 {dimension_numbers = #tpu.dot_dimension_numbers<[1], [0], [0], [1], [0, 0, 1, 1], [], []>} : vector<8x128xf32>, vector<128x128xf32>, vector<8x128xf32> -> vector<8x128xf32>
    %6 = arith.addf %2, %5 : vector<8x128xf32>
    %c0_8 = arith.constant 0 : index
    %c0_9 = arith.constant 0 : index
    %7 = vector.load %arg6[%c0_8, %c0_9] : memref<1x128xf32, #tpu.memory_space<vmem>>, vector<1x128xf32>
    %8 = vector.broadcast %7 : vector<1x128xf32> to vector<8x128xf32>
    %9 = arith.addf %6, %8 : vector<8x128xf32>
    %10 = arith.negf %9 : vector<8x128xf32>
    %11 = math.exp %10 : vector<8x128xf32>
    %cst_10 = arith.constant 1.000000e+00 : f32
    %12 = vector.broadcast %cst_10 : f32 to vector<8x128xf32>
    %13 = arith.addf %12, %11 : vector<8x128xf32>
    %14 = arith.divf %12, %13 : vector<8x128xf32>
    %15 = math.tanh %9 : vector<8x128xf32>
    %c0_11 = arith.constant 0 : index
    %c0_12 = arith.constant 0 : index
    %16 = vector.load %arg3[%c0_11, %c0_12] : memref<8x128xf32, #tpu.memory_space<vmem>>, vector<8x128xf32>
    %17 = arith.addf %16, %15 : vector<8x128xf32>
    %18 = arith.mulf %14, %17 : vector<8x128xf32>
    %19 = math.tanh %18 : vector<8x128xf32>
    %20 = arith.mulf %14, %19 : vector<8x128xf32>
    %c0_13 = arith.constant 0 : index
    %c0_14 = arith.constant 0 : index
    %21 = vector.load %arg7[%c0_13, %c0_14] : memref<8x128xf32, #tpu.memory_space<vmem>>, vector<8x128xf32>
    tpu.vector_store %arg7[%c0_13, %c0_14], %20 {strides = array<i32>} : memref<8x128xf32, #tpu.memory_space<vmem>>, vector<8x128xf32>,
    %c0_15 = arith.constant 0 : index
    %c0_16 = arith.constant 0 : index
    %22 = vector.load %arg8[%c0_15, %c0_16] : memref<8x128xf32, #tpu.memory_space<vmem>>, vector<8x128xf32>
    tpu.vector_store %arg8[%c0_15, %c0_16], %18 {strides = array<i32>} : memref<8x128xf32, #tpu.memory_space<vmem>>, vector<8x128xf32>,
    return
  }
  func.func @transform_0(%arg0: i32) -> (i32, i32) {
    %c0_i32 = arith.constant 0 : i32
    %c0_i32_0 = arith.constant 0 : i32
    return %arg0, %c0_i32 : i32, i32
  }
  func.func @transform_1(%arg0: i32) -> (i32, i32) {
    %c0_i32 = arith.constant 0 : i32
    %c0_i32_0 = arith.constant 0 : i32
    return %arg0, %c0_i32 : i32, i32
  }
  func.func @transform_2(%arg0: i32) -> (i32, i32) {
    %c0_i32 = arith.constant 0 : i32
    %c0_i32_0 = arith.constant 0 : i32
    return %arg0, %c0_i32 : i32, i32
  }
  func.func @transform_3(%arg0: i32) -> (i32, i32) {
    %c0_i32 = arith.constant 0 : i32
    %c0_i32_0 = arith.constant 0 : i32
    %c0_i32_1 = arith.constant 0 : i32
    return %c0_i32, %c0_i32_0 : i32, i32
  }
  func.func @transform_4(%arg0: i32) -> (i32, i32) {
    %c0_i32 = arith.constant 0 : i32
    %c0_i32_0 = arith.constant 0 : i32
    %c0_i32_1 = arith.constant 0 : i32
    return %c0_i32, %c0_i32_0 : i32, i32
  }
  func.func @transform_5(%arg0: i32) -> (i32, i32) {
    %c0_i32 = arith.constant 0 : i32
    %c0_i32_0 = arith.constant 0 : i32
    %c0_i32_1 = arith.constant 0 : i32
    return %c0_i32, %c0_i32_0 : i32, i32
  }
  func.func @transform_6(%arg0: i32) -> (i32, i32) {
    %c0_i32 = arith.constant 0 : i32
    %c0_i32_0 = arith.constant 0 : i32
    return %arg0, %c0_i32 : i32, i32
  }
  func.func @transform_7(%arg0: i32) -> (i32, i32) {
    %c0_i32 = arith.constant 0 : i32
    %c0_i32_0 = arith.constant 0 : i32
    return %arg0, %c0_i32 : i32, i32
  }
}

</mosaic_0001>

<bundles_post_ra>
// kernel: lstm_cell.1
= control target key start
LH: loop header
LB: loop body
LE: loop exit
PB: predicated region body
PF: predicated region fallthrough
CT: control target
= control target key end

     0   :  { %13 = vsyncpa [#allocation3], 0  ;;  %s581_s0 = inlined_call_operand.vmem [shape: f32[8,128], index: 0, kind: input, shape index: {}]   ;;  %s582_s1 = inlined_call_operand.vmem [shape: f32[8,128], index: 1, kind: input, shape index: {}]   ;;  %s583_s2 = inlined_call_operand.vmem [shape: f32[8,128], index: 2, kind: input, shape index: {}, may-alias: {2,7}]   ;;  %s584_s3 = inlined_call_operand.hbm [shape: f32[128,128], index: 3, kind: input, shape index: {}]   ;;  %s585_s4 = inlined_call_operand.hbm [shape: f32[128,128], index: 4, kind: input, shape index: {}]   ;;  %s586_s5 = inlined_call_operand.vmem [shape: f32[1,128], index: 5, kind: input, shape index: {}]   ;;  %s587_s6 = inlined_call_operand.vmem [shape: f32[8,128], index: 6, kind: output, shape index: {0}]   ;;  %s588_s7 = inlined_call_operand.vmem [shape: f32[8,128], index: 7, kind: output, shape index: {1}, may-alias: {2,7}]  }
   0x1   :  { %14 = vsyncpa [#allocation5], 0  ;;  %s476_s24 = smov [#allocation2]   ;;  %s428_s28 = scalar_lea.hbm %s584_s3, 2048 }
   0x2   :  { %s26_s25 = sshll.u32 %s476_s24, 4  ;;  %p429_p0 = scmp.ne.s32.totalorder %s584_s3, %s428_s28  ;;  %s27_s25 = int_to_ptr.vmem [resolvable:$true] %s26_s25 }
   0x3   :  { %p432_p1 = scmp.lt.u32.totalorder %s428_s28, %s584_s3 }
   0x5   :  { %p434_p2 = pnand %p432_p1, %p429_p0 }
   0x7   :  { %437 = shalt.err (!%p434_p2)
}
   0x8   :  { %s438_s10 = scalar_lea.vmem %s27_s25, 2048  ;;  %p443_p4 = scmp.lt.s32.totalorder %s27_s25, %s27_s25 }
   0x9   :  { %p439_p3 = scmp.ne.s32.totalorder %s27_s25, %s438_s10  ;;  %p444_p5 = scmp.lt.s32.totalorder %s438_s10, %s438_s10 }
   0xb   :  { %p445_p6 = por %p444_p5, %p443_p4 }
   0xd   :  { %p446_p7 = pnand %p445_p6, %p439_p3 }
   0xf   :  { %449 = shalt.err (!%p446_p7)
}
  0x10   :  { %s477_s11 = smov 128   ;;  %s478_s12 = smov 8  }
  0x11   :  { %32 = dma.hbm_to_vmem [thread:$0]  %s584_s3, 2048, %s27_s25, [#allocation3], %s477_s11, %s477_s11, %s478_s12  }
  0x12   :  { %s479_s15 = smov [#allocation4]   ;;  %s450_s19 = scalar_lea.hbm %s585_s4, 2048 }
  0x13   :  { %s38_s16 = sshll.u32 %s479_s15, 4  ;;  %p451_p8 = scmp.ne.s32.totalorder %s585_s4, %s450_s19  ;;  %s39_s16 = int_to_ptr.vmem [resolvable:$true] %s38_s16 }
  0x14   :  { %p454_p9 = scmp.lt.u32.totalorder %s450_s19, %s585_s4 }
  0x16   :  { %p456_p10 = pnand %p454_p9, %p451_p8 }
  0x18   :  { %459 = shalt.err (!%p456_p10)
}
  0x19   :  { %s460_s24 = scalar_lea.vmem %s39_s16, 2048  ;;  %p465_p12 = scmp.lt.s32.totalorder %s39_s16, %s39_s16 }
  0x1a   :  { %p461_p11 = scmp.ne.s32.totalorder %s39_s16, %s460_s24  ;;  %p466_p13 = scmp.lt.s32.totalorder %s460_s24, %s460_s24 }
  0x1c   :  { %p467_p0 = por %p466_p13, %p465_p12 }
  0x1e   :  { %p468_p1 = pnand %p467_p0, %p461_p11 }
  0x20   :  { %471 = shalt.err (!%p468_p1)
}
  0x21   :  { %44 = dma.hbm_to_vmem [thread:$0]  %s585_s4, 2048, %s39_s16, [#allocation5], %s477_s11, %s477_s11, %s478_s12  }
  0x22   :  { %472 = dma.done.wait [#allocation3], 2048  }
  0x23   :  { %473 = vsyncadd [#allocation3], 4294965248 }
  0x24   :  { %474 = dma.done.wait [#allocation5], 2048  }
  0x25   :  { %475 = vsyncadd [#allocation5], 4294965248  ;;  %v480_v0 = vmov 0.0|0.0   ;;  %vm481_vm0 = vmmov 0   ;;  %v482_v1 = vmov 0.0   ;;  %v71_v2 = vld [vmem:[#allocation4] sm:$0xff] }
  0x26   :  { %365 = vmatprep.subr.bf16.mxu0 %v480_v0  ;;  %389 = vmatprep.subr.bf16.mxu1 %v480_v0  ;;  %v72_v3 = vld [vmem:[#allocation4 + $0x8] sm:$0xff]  ;;  %v54_v4 = vld [vmem:[#allocation2] sm:$0xff]  ;;  %v73_v7 = vld [vmem:[#allocation4 + $0x10] sm:$0xff] }
  0x27   :  { %327 = vmatprep.mubr.msk.f32.mxu0 %vm481_vm0, %v482_v1  ;;  %362 = vmatprep.mubr.msk.f32.mxu1 %vm481_vm0, %v482_v1  ;;  %v366_v5 = vpack.c.bf16 %v72_v3, %v71_v2  ;;  %v55_v6 = vld [vmem:[#allocation2 + $0x8] sm:$0xff]  ;;  %v74_v8 = vld [vmem:[#allocation4 + $0x18] sm:$0xff]  ;;  %v56_v10 = vld [vmem:[#allocation2 + $0x10] sm:$0xff] }
  0x28   :  { %v390_v9 = vpack.c.bf16 %v55_v6, %v54_v4  ;;  %v57_v11 = vld [vmem:[#allocation2 + $0x18] sm:$0xff]  ;;  %v369_v12 = vpack.c.bf16 %v74_v8, %v73_v7  ;;  %v75_v14 = vld [vmem:[#allocation4 + $0x20] sm:$0xff]  ;;  %v76_v15 = vld [vmem:[#allocation4 + $0x28] sm:$0xff] }
  0x29   :  { %367 = vmatpush3.bf16.msra.mxu0 %v366_v5  ;;  %v393_v13 = vpack.c.bf16 %v57_v11, %v56_v10  ;;  %v58_v16 = vld [vmem:[#allocation2 + $0x20] sm:$0xff]  ;;  %v59_v17 = vld [vmem:[#allocation2 + $0x28] sm:$0xff]  ;;  %v372_v18 = vpack.c.bf16 %v76_v15, %v75_v14  ;;  %v77_v20 = vld [vmem:[#allocation4 + $0x30] sm:$0xff] }
  0x2a   :  { %391 = vmatpush3.bf16.msra.mxu1 %v390_v9  ;;  %368 = vmatprep.subr.bf16.mxu0 %v480_v0  ;;  %v396_v19 = vpack.c.bf16 %v59_v17, %v58_v16  ;;  %v78_v21 = vld [vmem:[#allocation4 + $0x38] sm:$0xff]  ;;  %v60_v22 = vld [vmem:[#allocation2 + $0x30] sm:$0xff]  ;;  %v79_v26 = vld [vmem:[#allocation4 + $0x40] sm:$0xff] }
  0x2b   :  { %392 = vmatprep.subr.bf16.mxu1 %v480_v0  ;;  %v61_v23 = vld [vmem:[#allocation2 + $0x38] sm:$0xff]  ;;  %v375_v24 = vpack.c.bf16 %v78_v21, %v77_v20  ;;  %v80_v27 = vld [vmem:[#allocation4 + $0x48] sm:$0xff]  ;;  %v62_v28 = vld [vmem:[#allocation2 + $0x40] sm:$0xff] }
  0x2c   :  { %v399_v25 = vpack.c.bf16 %v61_v23, %v60_v22  ;;  %v63_v29 = vld [vmem:[#allocation2 + $0x48] sm:$0xff]  ;;  %v378_v30 = vpack.c.bf16 %v80_v27, %v79_v26  ;;  %v81_v32 = vld [vmem:[#allocation4 + $0x50] sm:$0xff]  ;;  %v82_v33 = vld [vmem:[#allocation4 + $0x58] sm:$0xff] }
  0x2d   :  { %370 = vmatpush3.bf16.msra.mxu0 %v369_v12  ;;  %v402_v31 = vpack.c.bf16 %v63_v29, %v62_v28  ;;  %v64_v34 = vld [vmem:[#allocation2 + $0x50] sm:$0xff]  ;;  %v65_v35 = vld [vmem:[#allocation2 + $0x58] sm:$0xff]  ;;  %v381_v36 = vpack.c.bf16 %v82_v33, %v81_v32  ;;  %v83_v38 = vld [vmem:[#allocation4 + $0x60] sm:$0xff] }
  0x2e   :  { %394 = vmatpush3.bf16.msra.mxu1 %v393_v13  ;;  %371 = vmatprep.subr.bf16.mxu0 %v480_v0  ;;  %v405_v37 = vpack.c.bf16 %v65_v35, %v64_v34  ;;  %v84_v39 = vld [vmem:[#allocation4 + $0x68] sm:$0xff]  ;;  %v66_v40 = vld [vmem:[#allocation2 + $0x60] sm:$0xff]  ;;  %v85_v44 = vld [vmem:[#allocation4 + $0x70] sm:$0xff] }
  0x2f   :  { %395 = vmatprep.subr.bf16.mxu1 %v480_v0  ;;  %v67_v41 = vld [vmem:[#allocation2 + $0x68] sm:$0xff]  ;;  %v384_v42 = vpack.c.bf16 %v84_v39, %v83_v38  ;;  %v86_v45 = vld [vmem:[#allocation4 + $0x78] sm:$0xff]  ;;  %v68_v46 = vld [vmem:[#allocation2 + $0x70] sm:$0xff] }
  0x30   :  { %v408_v43 = vpack.c.bf16 %v67_v41, %v66_v40  ;;  %v69_v47 = vld [vmem:[#allocation2 + $0x78] sm:$0xff]  ;;  %v387_v48 = vpack.c.bf16 %v86_v45, %v85_v44  ;;  %v70_v50 = vld [vmem:[%s582_s1] sm:$0xff] }
  0x31   :  { %373 = vmatpush3.bf16.msra.mxu0 %v372_v18  ;;  %v411_v49 = vpack.c.bf16 %v69_v47, %v68_v46  ;;  %v53_v51 = vld [vmem:[%s581_s0] sm:$0xff] }
  0x32   :  { %397 = vmatpush3.bf16.msra.mxu1 %v396_v19  ;;  %374 = vmatprep.subr.bf16.mxu0 %v480_v0  ;;  %v259_v54 = vld [vmem:[%s586_s5] ss:$0 sm:$0xff] }
  0x33   :  { %398 = vmatprep.subr.bf16.mxu1 %v480_v0  ;;  %v242_v63 = vld [vmem:[%s583_s2] sm:$0xff] }
  0x35   :  { %376 = vmatpush3.bf16.msra.mxu0 %v375_v24 }
  0x36   :  { %400 = vmatpush3.bf16.msra.mxu1 %v399_v25  ;;  %377 = vmatprep.subr.bf16.mxu0 %v480_v0 }
  0x37   :  { %401 = vmatprep.subr.bf16.mxu1 %v480_v0 }
  0x39   :  { %379 = vmatpush3.bf16.msra.mxu0 %v378_v30 }
  0x3a   :  { %403 = vmatpush3.bf16.msra.mxu1 %v402_v31  ;;  %380 = vmatprep.subr.bf16.mxu0 %v480_v0 }
  0x3b   :  { %404 = vmatprep.subr.bf16.mxu1 %v480_v0 }
  0x3d   :  { %382 = vmatpush3.bf16.msra.mxu0 %v381_v36 }
  0x3e   :  { %406 = vmatpush3.bf16.msra.mxu1 %v405_v37  ;;  %383 = vmatprep.subr.bf16.mxu0 %v480_v0 }
  0x3f   :  { %407 = vmatprep.subr.bf16.mxu1 %v480_v0 }
  0x41   :  { %385 = vmatpush3.bf16.msra.mxu0 %v384_v42 }
  0x42   :  { %409 = vmatpush3.bf16.msra.mxu1 %v408_v43  ;;  %386 = vmatprep.subr.bf16.mxu0 %v480_v0 }
  0x43   :  { %410 = vmatprep.subr.bf16.mxu1 %v480_v0 }
  0x45   :  { %388 = vmatpush3.bf16.msra.mxu0 %v387_v48 }
  0x46   :  { %412 = vmatpush3.bf16.msra.mxu1 %v411_v49 }
  0x48   :  { %328 = vmatmul.mubr.f32.vlgmr.msra.gmra.mrb[0].mxu0 %v70_v50 }
  0x49   :  { %363 = vmatmul.mubr.f32.vlgmr.msra.gmra.mrb[0].mxu1 %v53_v51 }
 0x11b   :  { %v153_v52 = vpop.f32.mrb[0].mxu0 }
 0x11c   :  { %v223_v53 = vpop.f32.mrb[0].mxu1  ;;  %v329_v55 = vpop.f32.mrb[1].mxu0 }
 0x11d   :  { %v224_v56 = vadd.f32 %v223_v53, %v153_v52  ;;  %v364_v57 = vpop.f32.mrb[1].mxu1 }
 0x11f   :  { %v234_v58 = vadd.f32 %v259_v54, %v224_v56 }
 0x121   :  { %v260_v59 = vmul.f32 -1.442695, %v234_v58 }
 0x123   :  { %420 = vpow2.f32 %v260_v59 }
 0x124   :  { %422 = vtanh.f32 %v234_v58 }
 0x12d   :  { %v421_v60 = vpop.eup %420 }
 0x12e   :  { %v238_v61 = vadd.f32 1.0, %v421_v60  ;;  %v423_v62 = vpop.eup %422 }
 0x12f   :  { %v243_v0 = vadd.f32 %v423_v62, %v242_v63 }
 0x130   :  { %424 = vrcp.f32 %v238_v61 }
 0x13a   :  { %v425_v1 = vpop.eup %424 }
 0x13b   :  { %v244_v2 = vmul.f32 %v425_v1, %v243_v0 }
 0x13d   :  { %426 = vtanh.f32 %v244_v2  ;;  %248 = vst [vmem:[%s588_s7] sm:$0xff] %v244_v2 }
 0x147   :  { %v427_v3 = vpop.eup %426 }
 0x148   :  { %v246_v4 = vmul.f32 %v427_v3, %v425_v1 }
 0x14a   :  { %247 = vst [vmem:[%s587_s6] sm:$0xff] %v246_v4 }
 0x14b   :  { %257 = vsyncpa [#allocation3], 1 }
 0x14c   :  { %258 = vsyncpa [#allocation5], 1 }

</bundles_post_ra>
